<compile_context>
chip_gen: v7x
topology: tpu7x:2x2x1
jax: 0.10.0
libtpu: 0.0.40
codegen_flags: <defaults>
</compile_context>

<pallas_src>
import math
from functools import partial

import jax
import jax.numpy as jnp
import numpy as np
from jax.experimental import pallas as pl
from jax.experimental.pallas import tpu as pltpu


def _upsample_conv_kernel(x_ref, w0_ref, w1_ref, w2_ref, b_ref, o_ref):
    """One (batch, row-tile) step of the fused upsample+conv.

    x_ref : (1, H+2, WC)    row-zero-padded input, rows flattened lane-dense over (j, ci)
    w0_ref: (WC, 2*WC)      parity-0 output columns, source window X0 = Xpad[i]
    w1_ref: (WC, 4*WC)      both parities, shared source window X1 = Xpad[i+1]
    w2_ref: (WC, 2*WC)      parity-1 output columns, source window X2 = Xpad[i+2]
    b_ref : (1, 4*WC)       bias tiled over (parity, output col, co)
    o_ref : (1, TH, 4*WC)   output rows; lanes = [parity-0 row | parity-1 row]
    """
    th = o_ref.shape[1]
    start = pl.multiple_of(pl.program_id(1) * th, th)
    # Three row-shifted windows loaded straight from the VMEM-resident ref.
    x0 = x_ref[0, pl.ds(start, th), :]
    x1 = x_ref[0, pl.ds(start + 1, th), :]
    x2 = x_ref[0, pl.ds(start + 2, th), :]
    # Shared middle window -> one wide N = 4*WC matmul covering both parities.
    acc = jnp.dot(x1, w1_ref[...], preferred_element_type=jnp.float32)
    # Outer windows contribute one parity half each; concat at a 128-aligned lane
    # boundary is just vreg placement.
    side = jnp.concatenate(
        [jnp.dot(x0, w0_ref[...], preferred_element_type=jnp.float32),
         jnp.dot(x2, w2_ref[...], preferred_element_type=jnp.float32)],
        axis=-1)
    # Single wide lane-dense store per step.
    o_ref[0] = (acc + side + b_ref[...]).astype(o_ref.dtype)


def _fold_weights(weight_oihw, W):
    """Fold nearest-2x upsample + 3x3 conv (pad=1) into band matrices B[a, u].

    Output row 2i+a, flattened over (2j+b, co) into length 2W*C, equals
        Xpad[i + a] @ B[a, 0] + Xpad[i + a + 1] @ B[a, 1] + bias
    where Xpad is the original input with one zero row top/bottom and rows
    flattened over (j, ci) into length W*C.
    """
    C = weight_oihw.shape[0]
    w = jnp.transpose(weight_oihw, (2, 3, 1, 0))              # (kh, kw, Cin, Cout)
    # Row-parity combined weights: which source-row offset u in {0,1} each kernel
    # row dy hits for output parity a (nearest-neighbour row duplication folded in).
    wrow = jnp.stack([
        jnp.stack([w[0], w[1] + w[2]], axis=0),               # a=0: u=0 <- dy0 ; u=1 <- dy1+dy2
        jnp.stack([w[0] + w[1], w[2]], axis=0),               # a=1: u=0 <- dy0+dy1 ; u=1 <- dy2
    ], axis=0)                                                # (2, 2, 3, Cin, Cout) = (a,u,dx,ci,co)
    # Column scatter (data independent): output col 2j+b with kernel col dx reads
    # original col jc = j + floor((b-1+dx)/2); out-of-range cols are the conv zero
    # padding and are simply dropped (nearest-neighbour col duplication folded in).
    dxs = np.arange(3)[:, None, None]
    bs = np.arange(2)[None, :, None]
    js = np.arange(W)[None, None, :]
    jc = js + (bs - 1 + dxs) // 2                             # (dx, b, j)
    scat = (jc[..., None] == np.arange(W)).astype(np.float32)  # (dx, b, j, jc)
    band = jnp.einsum('dbjk,audio->aukijbo', jnp.asarray(scat), wrow)
    return band.reshape(2, 2, W * C, 2 * W * C)


def _pick_row_tile(H, N):
    """Largest 8-aligned divisor of H up to 256 (MXU fill vs. grid-step overhead).

    When N == 1, cap near H/2 so the grid keeps >=2 steps along a 'parallel' axis
    (v7x has 2 TensorCores); v5e/v6e are single-core so fewer, bigger steps are fine.
    """
    cap = 256 if N > 1 else max(8, min(256, H // 2))
    best = H  # fallback: whole image (legal; masked sublane stores if H % 8 != 0)
    for cand in range(8, min(H, cap) + 1, 8):
        if H % cand == 0:
            best = cand
    return best


@partial(jax.jit, static_argnames=("compute_dtype",))
def upsample_forward(x_nchw, weight_oihw, bias, *, compute_dtype=jnp.float32):
    """Equivalent of Conv2d(dim, dim, 3, padding=1)(Upsample(scale=2, 'nearest')(x))."""
    N, C, H, W = x_nchw.shape
    H2, W2 = 2 * H, 2 * W
    WC = W * C
    cdt = jnp.dtype(compute_dtype)
    th = _pick_row_tile(H, N)

    # Layout glue only (one XLA pass over x) — the upsampled image is never in HBM.
    x_rows = jnp.transpose(x_nchw, (0, 2, 3, 1)).reshape(N, H, WC)
    x_pad = jnp.pad(x_rows, ((0, 0), (1, 1), (0, 0))).astype(cdt)   # (N, H+2, WC)

    band = _fold_weights(weight_oihw, W)                      # (2, 2, WC, 2*WC) f32
    # Parity folded into the N (lane) dimension:
    #   parity-0 output row = X0 @ w0 + X1 @ w1[:, :2WC]
    #   parity-1 output row = X1 @ w1[:, 2WC:] + X2 @ w2
    w0 = band[0, 0].astype(cdt)                               # (WC, 2*WC)
    w1 = jnp.concatenate([band[0, 1], band[1, 0]], axis=1).astype(cdt)  # (WC, 4*WC)
    w2 = band[1, 1].astype(cdt)                               # (WC, 2*WC)
    bias_line = jnp.tile(bias, 2 * W2).reshape(1, 4 * WC).astype(jnp.float32)

    # MXU flops actually executed by the 3 band matmuls (not the logical conv flops).
    flops = 16 * N * H * WC * WC
    bytes_accessed = int(cdt.itemsize) * (
        x_pad.size + w0.size + w1.size + w2.size + N * H * 4 * WC
    ) + 4 * bias_line.size

    out = pl.pallas_call(
        _upsample_conv_kernel,
        out_shape=jax.ShapeDtypeStruct((N, H, 4 * WC), cdt),
        grid=(N, H // th),
        in_specs=[
            pl.BlockSpec((1, H + 2, WC), lambda n, t: (n, 0, 0)),
            pl.BlockSpec((WC, 2 * WC), lambda n, t: (0, 0)),
            pl.BlockSpec((WC, 4 * WC), lambda n, t: (0, 0)),
            pl.BlockSpec((WC, 2 * WC), lambda n, t: (0, 0)),
            pl.BlockSpec((1, 4 * WC), lambda n, t: (0, 0)),
        ],
        out_specs=pl.BlockSpec((1, th, 4 * WC), lambda n, t: (n, t, 0)),
        compiler_params=pltpu.CompilerParams(
            dimension_semantics=("parallel", "parallel"),
            vmem_limit_bytes=32 * 1024 * 1024,
        ),
        cost_estimate=pl.CostEstimate(
            flops=flops, transcendentals=0, bytes_accessed=bytes_accessed),
    )(x_pad, w0, w1, w2, bias_line)

    # out[n, i, a*(2*WC) + (2j+b)*C + co] == O_nchw[n, co, 2i+a, 2j+b]
    out = out.reshape(N, H, 2, W2, C)
    out = jnp.transpose(out, (0, 4, 1, 2, 3))                 # (N, C, H, 2, W2)
    return out.reshape(N, C, H2, W2).astype(x_nchw.dtype)


def _reference(x_nchw, weight_oihw, bias):
    """Pure-JAX reference (nearest 2x upsample + conv) for verification."""
    x_up = jnp.repeat(jnp.repeat(x_nchw, 2, axis=2), 2, axis=3)
    out = jax.lax.conv_general_dilated(
        x_up, weight_oihw,
        window_strides=(1, 1), padding=((1, 1), (1, 1)),
        dimension_numbers=("NCHW", "OIHW", "NCHW"),
    )
    return out + bias.reshape(1, -1, 1, 1)


if __name__ == "__main__":
    key = jax.random.PRNGKey(0)
    kx, kw, kb = jax.random.split(key, 3)

    N, C, H, W = 2, 4, 16, 16   # dim = 4
    x = jax.random.normal(kx, (N, C, H, W), dtype=jnp.float32)

    # Deterministic Conv2d(dim, dim, 3) parameter init (kaiming-uniform style).
    fan_in = C * 3 * 3
    bound = 1.0 / math.sqrt(fan_in)
    weight = jax.random.uniform(kw, (C, C, 3, 3), jnp.float32, -bound, bound)
    bias = jax.random.uniform(kb, (C,), jnp.float32, -bound, bound)

    ref = _reference(x, weight, bias)

    # f32 path: exact check against the reference.
    out = jax.block_until_ready(upsample_forward(x, weight, bias))
    assert out.shape == (N, C, 2 * H, 2 * W), out.shape
    assert jnp.allclose(out, ref, atol=1e-5, rtol=1e-5), (
        float(jnp.max(jnp.abs(out - ref))))

    # bf16 operands / f32 accumulation path (v6e/v7x bf16-native MXU): relaxed tolerance.
    out_bf16 = jax.block_until_ready(
        upsample_forward(x, weight, bias, compute_dtype=jnp.bfloat16))
    assert out_bf16.shape == (N, C, 2 * H, 2 * W), out_bf16.shape
    assert jnp.allclose(out_bf16, ref, atol=5e-2, rtol=5e-2), (
        float(jnp.max(jnp.abs(out_bf16 - ref))))

    print("KERNEL_OK")
</pallas_src>

<mosaic_0001>
module attributes {stable_mosaic.version = 11 : i64} {
  func.func @_upsample_conv_kernel(%arg0: i32, %arg1: i32, %arg2: memref<1x18x64xf32, #tpu.memory_space<vmem>>, %arg3: memref<64x128xf32, #tpu.memory_space<vmem>>, %arg4: memref<64x256xf32, #tpu.memory_space<vmem>>, %arg5: memref<64x128xf32, #tpu.memory_space<vmem>>, %arg6: memref<1x256xf32, #tpu.memory_space<vmem>>, %arg7: memref<1x16x256xf32, #tpu.memory_space<vmem>>) attributes {dimension_semantics = [#tpu.dimension_semantics<parallel>, #tpu.dimension_semantics<parallel>], iteration_bounds = array<i64: 2, 1>, scalar_prefetch = 0 : i64, scratch_operands = 0 : i64, tpu.core_type = #tpu.core_type<tc>, window_params = [{transform_indices = @transform_0, window_bounds = array<i64: 1, 18, 64>}, {pipeline_mode = #tpu.pipeline_mode<synchronous>, transform_indices = @transform_1, window_bounds = array<i64: 64, 128>}, {pipeline_mode = #tpu.pipeline_mode<synchronous>, transform_indices = @transform_2, window_bounds = array<i64: 64, 256>}, {pipeline_mode = #tpu.pipeline_mode<synchronous>, transform_indices = @transform_3, window_bounds = array<i64: 64, 128>}, {pipeline_mode = #tpu.pipeline_mode<synchronous>, transform_indices = @transform_4, window_bounds = array<i64: 1, 256>}, {transform_indices = @transform_5, window_bounds = array<i64: 1, 16, 256>}]} {
    %c16_i32 = arith.constant 16 : i32
    %0 = arith.muli %arg1, %c16_i32 : i32
    %1 = tpu.assume_multiple %0, 16 : i32
    %c0 = arith.constant 0 : index
    %2 = arith.index_cast %1 : i32 to index
    %c0_0 = arith.constant 0 : index
    %3 = vector.load %arg2[%c0, %2, %c0_0] : memref<1x18x64xf32, #tpu.memory_space<vmem>>, vector<1x16x64xf32>
    %4 = vector.shape_cast %3 : vector<1x16x64xf32> to vector<16x64xf32>
    %c1_i32 = arith.constant 1 : i32
    %5 = arith.addi %1, %c1_i32 : i32
    %c0_1 = arith.constant 0 : index
    %6 = arith.index_cast %5 : i32 to index
    %c0_2 = arith.constant 0 : index
    %7 = vector.load %arg2[%c0_1, %6, %c0_2] : memref<1x18x64xf32, #tpu.memory_space<vmem>>, vector<1x16x64xf32>
    %8 = vector.shape_cast %7 : vector<1x16x64xf32> to vector<16x64xf32>
    %c2_i32 = arith.constant 2 : i32
    %9 = arith.addi %1, %c2_i32 : i32
    %c0_3 = arith.constant 0 : index
    %10 = arith.index_cast %9 : i32 to index
    %c0_4 = arith.constant 0 : index
    %11 = vector.load %arg2[%c0_3, %10, %c0_4] : memref<1x18x64xf32, #tpu.memory_space<vmem>>, vector<1x16x64xf32>
    %12 = vector.shape_cast %11 : vector<1x16x64xf32> to vector<16x64xf32>
    %c0_5 = arith.constant 0 : index
    %c0_6 = arith.constant 0 : index
    %13 = vector.load %arg4[%c0_5, %c0_6] : memref<64x256xf32, #tpu.memory_space<vmem>>, vector<64x256xf32>
    %cst = arith.constant dense<0.000000e+00> : vector<16x256xf32>
    %14 = tpu.matmul %8, %13, %cst {dimension_numbers = #tpu.dot_dimension_numbers<[1], [0], [0], [1], [0, 0, 1, 1], [], []>} : vector<16x64xf32>, vector<64x256xf32>, vector<16x256xf32> -> vector<16x256xf32>
    %c0_7 = arith.constant 0 : index
    %c0_8 = arith.constant 0 : index
    %15 = vector.load %arg3[%c0_7, %c0_8] : memref<64x128xf32, #tpu.memory_space<vmem>>, vector<64x128xf32>
    %cst_9 = arith.constant dense<0.000000e+00> : vector<16x128xf32>
    %16 = tpu.matmul %4, %15, %cst_9 {dimension_numbers = #tpu.dot_dimension_numbers<[1], [0], [0], [1], [0, 0, 1, 1], [], []>} : vector<16x64xf32>, vector<64x128xf32>, vector<16x128xf32> -> vector<16x128xf32>
    %c0_10 = arith.constant 0 : index
    %c0_11 = arith.constant 0 : index
    %17 = vector.load %arg5[%c0_10, %c0_11] : memref<64x128xf32, #tpu.memory_space<vmem>>, vector<64x128xf32>
    %cst_12 = arith.constant dense<0.000000e+00> : vector<16x128xf32>
    %18 = tpu.matmul %12, %17, %cst_12 {dimension_numbers = #tpu.dot_dimension_numbers<[1], [0], [0], [1], [0, 0, 1, 1], [], []>} : vector<16x64xf32>, vector<64x128xf32>, vector<16x128xf32> -> vector<16x128xf32>
    %19 = tpu.concatenate %16, %18 in 1 : vector<16x128xf32>, vector<16x128xf32> -> vector<16x256xf32>
    %20 = arith.addf %14, %19 : vector<16x256xf32>
    %c0_13 = arith.constant 0 : index
    %c0_14 = arith.constant 0 : index
    %21 = vector.load %arg6[%c0_13, %c0_14] : memref<1x256xf32, #tpu.memory_space<vmem>>, vector<1x256xf32>
    %22 = vector.broadcast %21 : vector<1x256xf32> to vector<16x256xf32>
    %23 = arith.addf %20, %22 : vector<16x256xf32>
    %c0_15 = arith.constant 0 : index
    %c0_16 = arith.constant 0 : index
    %c0_17 = arith.constant 0 : index
    %24 = vector.load %arg7[%c0_15, %c0_16, %c0_17] : memref<1x16x256xf32, #tpu.memory_space<vmem>>, vector<1x16x256xf32>
    %25 = vector.shape_cast %24 : vector<1x16x256xf32> to vector<16x256xf32>
    %26 = vector.shape_cast %23 : vector<16x256xf32> to vector<1x16x256xf32>
    tpu.vector_store %arg7[%c0_15, %c0_16, %c0_17], %26 {strides = array<i32>} : memref<1x16x256xf32, #tpu.memory_space<vmem>>, vector<1x16x256xf32>,
    return
  }
  func.func @transform_0(%arg0: i32, %arg1: i32) -> (i32, i32, i32) {
    %c0_i32 = arith.constant 0 : i32
    %c0_i32_0 = arith.constant 0 : i32
    %c0_i32_1 = arith.constant 0 : i32
    return %arg0, %c0_i32, %c0_i32_0 : i32, i32, i32
  }
  func.func @transform_1(%arg0: i32, %arg1: i32) -> (i32, i32) {
    %c0_i32 = arith.constant 0 : i32
    %c0_i32_0 = arith.constant 0 : i32
    %c0_i32_1 = arith.constant 0 : i32
    return %c0_i32, %c0_i32_0 : i32, i32
  }
  func.func @transform_2(%arg0: i32, %arg1: i32) -> (i32, i32) {
    %c0_i32 = arith.constant 0 : i32
    %c0_i32_0 = arith.constant 0 : i32
    %c0_i32_1 = arith.constant 0 : i32
    return %c0_i32, %c0_i32_0 : i32, i32
  }
  func.func @transform_3(%arg0: i32, %arg1: i32) -> (i32, i32) {
    %c0_i32 = arith.constant 0 : i32
    %c0_i32_0 = arith.constant 0 : i32
    %c0_i32_1 = arith.constant 0 : i32
    return %c0_i32, %c0_i32_0 : i32, i32
  }
  func.func @transform_4(%arg0: i32, %arg1: i32) -> (i32, i32) {
    %c0_i32 = arith.constant 0 : i32
    %c0_i32_0 = arith.constant 0 : i32
    %c0_i32_1 = arith.constant 0 : i32
    return %c0_i32, %c0_i32_0 : i32, i32
  }
  func.func @transform_5(%arg0: i32, %arg1: i32) -> (i32, i32, i32) {
    %c0_i32 = arith.constant 0 : i32
    %c0_i32_0 = arith.constant 0 : i32
    return %arg0, %arg1, %c0_i32 : i32, i32, i32
  }
}

</mosaic_0001>

<bundles_post_ra>
// kernel: tile.8
= control target key start
LH: loop header
LB: loop body
LE: loop exit
PB: predicated region body
PF: predicated region fallthrough
CT: control target
= control target key end

     0   :  { %s64_s0 = inlined_call_operand.vmem [shape: f32[4], index: 0, kind: input, shape index: {}]   ;;  %s65_s1 = inlined_call_operand.vmem [shape: f32[64,4], index: 1, kind: output, shape index: {}]  }
   0x1   :  { %v4_v0 = vld [vmem:[%s64_s0] ss:$0 sm:$0xff] }
   0x2   :  { %5 = vst [vmem:[%s65_s1] sm:$0xff] %v4_v0  ;;  %20 = vst [vmem:[%s65_s1 + $0x8] sm:$0xff] %v4_v0 }
   0x3   :  { %21 = vst [vmem:[%s65_s1 + $0x10] sm:$0xff] %v4_v0  ;;  %22 = vst [vmem:[%s65_s1 + $0x18] sm:$0xff] %v4_v0 }
   0x4   :  { %23 = vst [vmem:[%s65_s1 + $0x20] sm:$0xff] %v4_v0  ;;  %24 = vst [vmem:[%s65_s1 + $0x28] sm:$0xff] %v4_v0 }
   0x5   :  { %25 = vst [vmem:[%s65_s1 + $0x30] sm:$0xff] %v4_v0  ;;  %26 = vst [vmem:[%s65_s1 + $0x38] sm:$0xff] %v4_v0 }

// kernel: tile.9
= control target key start
LH: loop header
LB: loop body
LE: loop exit
PB: predicated region body
PF: predicated region fallthrough
CT: control target
= control target key end

     0   :  { %vm5_vm0 = vcmask 1041409   ;;  %s425_s14 = smov 124   ;;  %s426_s21 = smov 116   ;;  %vm7_vm1 = vcmask 31744   ;;  %vm17_vm2 = vcmask 1048544   ;;  %vm27_vm3 = vcmask 1015744   ;;  %s696_s0 = inlined_call_operand.vmem [shape: f32[64,4], index: 0, kind: input, shape index: {}]   ;;  %s697_s1 = inlined_call_operand.vmem [shape: f32[1,256], index: 1, kind: output, shape index: {}]  }
   0x1   :  { %v331_v0 = vld [vmem:[%s696_s0 + $0x1f] sm:$0x1]   ;;  %v335_v3 = vld [vmem:[%s696_s0 + $0x1d] sm:$0x1]   ;;  %v333_v6 = vld [vmem:[%s696_s0 + $0x1e] sm:$0x1]  }
   0x2   :  { %v332_v1 = vld [vmem:[%s696_s0 + $0x3e] sm:$0x2]   ;;  %v336_v4 = vld [vmem:[%s696_s0 + $0x3c] sm:$0x2]   ;;  %v334_v7 = vld [vmem:[%s696_s0 + $0x3d] sm:$0x2]  }
   0x3   :  { %v14_v2 = vsel %vm5_vm0, %v332_v1, %v331_v0  ;;  %v34_v5 = vsel %vm5_vm0, %v336_v4, %v335_v3  ;;  %v337_v8 = vld [vmem:[%s696_s0 + $0x1c] sm:$0x1]   ;;  %v24_v9 = vsel %vm5_vm0, %v334_v7, %v333_v6  ;;  %v339_v12 = vld [vmem:[%s696_s0 + $0x1b] sm:$0x1]   ;;  %v341_v14 = vld [vmem:[%s696_s0 + $0x1a] sm:$0x1]  }
   0x4   :  { %15 = vrot.lane.b32.xlu0 %v14_v2, %s425_s14  ;;  %35 = vrot.lane.b32.xlu1 %v34_v5, %s426_s21  ;;  %v338_v10 = vld [vmem:[%s696_s0 + $0x3b] sm:$0x2]   ;;  %v340_v13 = vld [vmem:[%s696_s0 + $0x3a] sm:$0x2]   ;;  %s427_s3 = smov 120   ;;  %s428_s4 = smov 112  }
   0x5   :  { %v44_v11 = vsel %vm5_vm0, %v338_v10, %v337_v8  ;;  %v342_v15 = vld [vmem:[%s696_s0 + $0x39] sm:$0x2]   ;;  %v54_v16 = vsel %vm5_vm0, %v340_v13, %v339_v12  ;;  %v343_v18 = vld [vmem:[%s696_s0 + $0x19] sm:$0x1]   ;;  %v345_v20 = vld [vmem:[%s696_s0 + $0x18] sm:$0x1]  }
   0x6   :  { %v64_v17 = vsel %vm5_vm0, %v342_v15, %v341_v14  ;;  %v344_v19 = vld [vmem:[%s696_s0 + $0x38] sm:$0x2]   ;;  %v346_v21 = vld [vmem:[%s696_s0 + $0x37] sm:$0x2]   ;;  %s429_s13 = smov 108   ;;  %s430_s14 = smov 104  }
   0x7   :  { %v74_v22 = vsel %vm5_vm0, %v344_v19, %v343_v18  ;;  %v84_v23 = vsel %vm5_vm0, %v346_v21, %v345_v20  ;;  %v347_v24 = vld [vmem:[%s696_s0 + $0x17] sm:$0x1]   ;;  %v349_v26 = vld [vmem:[%s696_s0 + $0x16] sm:$0x1]   ;;  %s431_s23 = smov 100   ;;  %s432_s24 = smov 96  }
   0x8   :  { %25 = vrot.lane.b32.xlu0 %v24_v9, %s427_s3  ;;  %45 = vrot.lane.b32.xlu1 %v44_v11, %s428_s4  ;;  %v348_v25 = vld [vmem:[%s696_s0 + $0x36] sm:$0x2]   ;;  %v350_v27 = vld [vmem:[%s696_s0 + $0x35] sm:$0x2]   ;;  %s433_s4 = smov 92   ;;  %s434_s5 = smov 88  }
   0x9   :  { %v94_v28 = vsel %vm5_vm0, %v348_v25, %v347_v24  ;;  %v104_v29 = vsel %vm5_vm0, %v350_v27, %v349_v26  ;;  %v351_v30 = vld [vmem:[%s696_s0 + $0x15] sm:$0x1]   ;;  %v353_v32 = vld [vmem:[%s696_s0 + $0x14] sm:$0x1]   ;;  %v355_v36 = vld [vmem:[%s696_s0 + $0x13] sm:$0x1]  }
   0xa   :  { %v352_v31 = vld [vmem:[%s696_s0 + $0x34] sm:$0x2]   ;;  %v354_v33 = vld [vmem:[%s696_s0 + $0x33] sm:$0x2]   ;;  %v356_v37 = vld [vmem:[%s696_s0 + $0x32] sm:$0x2]  }
   0xb   :  { %v114_v34 = vsel %vm5_vm0, %v352_v31, %v351_v30  ;;  %v124_v35 = vsel %vm5_vm0, %v354_v33, %v353_v32  ;;  %v357_v38 = vld [vmem:[%s696_s0 + $0x12] sm:$0x1]   ;;  %s436_s15 = smov 80   ;;  %v134_v40 = vsel %vm5_vm0, %v356_v37, %v355_v36  ;;  %v359_v42 = vld [vmem:[%s696_s0 + $0x11] sm:$0x1]   ;;  %s438_s29 = smov 72  }
   0xc   :  { %55 = vrot.lane.b32.xlu0 %v54_v16, %s429_s13  ;;  %65 = vrot.lane.b32.xlu1 %v64_v17, %s430_s14  ;;  %v358_v39 = vld [vmem:[%s696_s0 + $0x31] sm:$0x2]   ;;  %s435_s14 = smov 84   ;;  %v360_v43 = vld [vmem:[%s696_s0 + $0x30] sm:$0x2]   ;;  %s439_s9 = smov 68  }
   0xd   :  { %v144_v41 = vsel %vm5_vm0, %v358_v39, %v357_v38  ;;  %v361_v44 = vld [vmem:[%s696_s0 + $0x10] sm:$0x1]   ;;  %v2_v46 = vld [vmem:[%s696_s0] sm:$0x1]   ;;  %v154_v48 = vsel %vm5_vm0, %v360_v43, %v359_v42  ;;  %v363_v51 = vld [vmem:[%s696_s0 + $0xf] sm:$0x1]  }
   0xe   :  { %v362_v45 = vld [vmem:[%s696_s0 + $0x2f] sm:$0x2]   ;;  %v330_v47 = vld [vmem:[%s696_s0 + $0x1f] sm:$0x2]   ;;  %v364_v52 = vld [vmem:[%s696_s0 + $0x2e] sm:$0x2]  }
   0xf   :  { %v6_v49 = vsel %vm5_vm0, %v330_v47, %v2_v46  ;;  %v164_v50 = vsel %vm5_vm0, %v362_v45, %v361_v44  ;;  %v365_v53 = vld [vmem:[%s696_s0 + $0xe] sm:$0x1]   ;;  %s440_s10 = smov 64   ;;  %v174_v55 = vsel %vm5_vm0, %v364_v52, %v363_v51  ;;  %v367_v57 = vld [vmem:[%s696_s0 + $0xd] sm:$0x1]   ;;  %s441_s19 = smov 60  }
  0x10   :  { %75 = vrot.lane.b32.xlu0 %v74_v22, %s431_s23  ;;  %85 = vrot.lane.b32.xlu1 %v84_v23, %s432_s24  ;;  %s437_s24 = smov 76   ;;  %8 = vst.msk [vmem:[#allocation0] ss:$8 sm:$0x3] %vm7_vm1, %v6_v49   ;;  %v366_v54 = vld [vmem:[%s696_s0 + $0x2d] sm:$0x2]  }
  0x11   :  { %v184_v56 = vsel %vm5_vm0, %v366_v54, %v365_v53  ;;  %v368_v58 = vld [vmem:[%s696_s0 + $0x2c] sm:$0x2]   ;;  %v369_v59 = vld [vmem:[%s696_s0 + $0xc] sm:$0x1]   ;;  %s442_s20 = smov 56   ;;  %s444_s30 = smov 48  }
  0x12   :  { %v370_v60 = vld [vmem:[%s696_s0 + $0x2b] sm:$0x2]   ;;  %v194_v61 = vsel %vm5_vm0, %v368_v58, %v367_v57  ;;  %v371_v63 = vld [vmem:[%s696_s0 + $0xb] sm:$0x1]   ;;  %v373_v1 = vld [vmem:[%s696_s0 + $0xa] sm:$0x1]  }
  0x13   :  { %v204_v62 = vsel %vm5_vm0, %v370_v60, %v369_v59  ;;  %v372_v0 = vld [vmem:[%s696_s0 + $0x2a] sm:$0x2]   ;;  %v374_v2 = vld [vmem:[%s696_s0 + $0x29] sm:$0x2]   ;;  %v375_v5 = vld [vmem:[%s696_s0 + $0x9] sm:$0x1]  }
  0x14   :  { %95 = vrot.lane.b32.xlu0 %v94_v28, %s433_s4  ;;  %105 = vrot.lane.b32.xlu1 %v104_v29, %s434_s5  ;;  %v214_v3 = vsel %vm5_vm0, %v372_v0, %v371_v63  ;;  %v224_v4 = vsel %vm5_vm0, %v374_v2, %v373_v1  ;;  %v376_v6 = vld [vmem:[%s696_s0 + $0x28] sm:$0x2]   ;;  %v377_v7 = vld [vmem:[%s696_s0 + $0x8] sm:$0x1]   ;;  %s446_s11 = smov 40   ;;  %s448_s21 = smov 32  }
  0x15   :  { %v378_v8 = vld [vmem:[%s696_s0 + $0x27] sm:$0x2]   ;;  %v234_v9 = vsel %vm5_vm0, %v376_v6, %v375_v5  ;;  %v379_v11 = vld [vmem:[%s696_s0 + $0x7] sm:$0x1]   ;;  %v381_v13 = vld [vmem:[%s696_s0 + $0x6] sm:$0x1]  }
  0x16   :  { %v244_v10 = vsel %vm5_vm0, %v378_v8, %v377_v7  ;;  %v380_v12 = vld [vmem:[%s696_s0 + $0x26] sm:$0x2]   ;;  %v382_v14 = vld [vmem:[%s696_s0 + $0x25] sm:$0x2]   ;;  %v383_v17 = vld [vmem:[%s696_s0 + $0x5] sm:$0x1]  }
  0x17   :  { %v254_v15 = vsel %vm5_vm0, %v380_v12, %v379_v11  ;;  %v264_v16 = vsel %vm5_vm0, %v382_v14, %v381_v13  ;;  %v384_v18 = vld [vmem:[%s696_s0 + $0x24] sm:$0x2]   ;;  %v385_v19 = vld [vmem:[%s696_s0 + $0x4] sm:$0x1]   ;;  %s450_s2 = smov 24   ;;  %s452_s12 = smov 16  }
  0x18   :  { %115 = vrot.lane.b32.xlu0 %v114_v34, %s435_s14  ;;  %125 = vrot.lane.b32.xlu1 %v124_v35, %s436_s15  ;;  %v386_v20 = vld [vmem:[%s696_s0 + $0x23] sm:$0x2]   ;;  %v274_v21 = vsel %vm5_vm0, %v384_v18, %v383_v17  ;;  %v387_v23 = vld [vmem:[%s696_s0 + $0x3] sm:$0x1]   ;;  %s454_s17 = smov 8   ;;  %s455_s18 = smov 4  }
  0x19   :  { %v284_v22 = vsel %vm5_vm0, %v386_v20, %v385_v19  ;;  %v388_v24 = vld [vmem:[%s696_s0 + $0x22] sm:$0x2]   ;;  %v389_v25 = vld [vmem:[%s696_s0 + $0x2] sm:$0x1]   ;;  %v391_v29 = vld [vmem:[%s696_s0 + $0x1] sm:$0x1]  }
  0x1a   :  { %v390_v26 = vld [vmem:[%s696_s0 + $0x21] sm:$0x2]   ;;  %v294_v27 = vsel %vm5_vm0, %v388_v24, %v387_v23  ;;  %v392_v30 = vld [vmem:[%s696_s0 + $0x20] sm:$0x2]   ;;  %s453_s0 = smov 12   ;;  %vm37_vm4 = vcmask 982944  }
  0x1b   :  { %v304_v28 = vsel %vm5_vm0, %v390_v26, %v389_v25  ;;  %v314_v31 = vsel %vm5_vm0, %v392_v30, %v391_v29  ;;  %vm47_vm5 = vcmask 950144   ;;  %vm57_vm6 = vcmask 917344  }
  0x1c   :  { %135 = vrot.lane.b32.xlu0 %v134_v40, %s437_s24  ;;  %145 = vrot.lane.b32.xlu1 %v144_v41, %s438_s29  ;;  %s443_s29 = smov 52   ;;  %vm67_vm7 = vcmask 884544   ;;  %vm77_vm8 = vcmask 851744   ;;  %vm87_vm9 = vcmask 818944   ;;  %vm97_vm10 = vcmask 786144  }
  0x1d   :  { %vm107_vm11 = vcmask 753344   ;;  %vm117_vm12 = vcmask 720544   ;;  %vm127_vm13 = vcmask 687744   ;;  %vm137_vm14 = vcmask 654944  }
  0x1e   :  { %vm147_vm15 = vcmask 622144   ;;  %vm157_vm0 = vcmask 589344   ;;  %vm167_vm1 = vcmask 556544  }
  0x20   :  { %155 = vrot.lane.b32.xlu0 %v154_v48, %s439_s9  ;;  %165 = vrot.lane.b32.xlu1 %v164_v50, %s440_s10  ;;  %s445_s10 = smov 44  }
  0x24   :  { %175 = vrot.lane.b32.xlu0 %v174_v55, %s441_s19  ;;  %185 = vrot.lane.b32.xlu1 %v184_v56, %s442_s20  ;;  %s447_s20 = smov 36  }
  0x28   :  { %195 = vrot.lane.b32.xlu0 %v194_v61, %s443_s29  ;;  %205 = vrot.lane.b32.xlu1 %v204_v62, %s444_s30  ;;  %s449_s30 = smov 28  }
  0x2c   :  { %215 = vrot.lane.b32.xlu0 %v214_v3, %s445_s10  ;;  %225 = vrot.lane.b32.xlu1 %v224_v4, %s446_s11  ;;  %s451_s11 = smov 20  }
  0x30   :  { %235 = vrot.lane.b32.xlu0 %v234_v9, %s447_s20  ;;  %245 = vrot.lane.b32.xlu1 %v244_v10, %s448_s21 }
  0x34   :  { %255 = vrot.lane.b32.xlu0 %v254_v15, %s449_s30  ;;  %265 = vrot.lane.b32.xlu1 %v264_v16, %s450_s2 }
  0x38   :  { %275 = vrot.lane.b32.xlu0 %v274_v21, %s451_s11  ;;  %285 = vrot.lane.b32.xlu1 %v284_v22, %s452_s12 }
  0x3c   :  { %295 = vrot.lane.b32.xlu0 %v294_v27, %s453_s0  ;;  %305 = vrot.lane.b32.xlu1 %v304_v28, %s454_s17 }
  0x40   :  { %315 = vrot.lane.b32.xlu0 %v314_v31, %s455_s18 }
  0x76   :  { %v16_v32 = vpop.permute.xlu0 %15   ;;  %v36_v33 = vpop.permute.xlu1 %35  }
  0x77   :  { %18 = vst.msk [vmem:[#allocation0] ss:$8 sm:$0x3] %vm17_vm2, %v16_v32   ;;  %vm177_vm2 = vcmask 523744  }
  0x7a   :  { %v26_v34 = vpop.permute.xlu0 %25   ;;  %v46_v35 = vpop.permute.xlu1 %45  }
  0x7b   :  { %28 = vst.msk [vmem:[#allocation0] ss:$8 sm:$0x3] %vm27_vm3, %v26_v34   ;;  %vm187_vm3 = vcmask 490944  }
  0x7c   :  { %38 = vst.msk [vmem:[#allocation0] ss:$8 sm:$0x3] %vm37_vm4, %v36_v33   ;;  %vm197_vm4 = vcmask 458144  }
  0x7d   :  { %48 = vst.msk [vmem:[#allocation0] ss:$8 sm:$0x3] %vm47_vm5, %v46_v35   ;;  %vm207_vm5 = vcmask 425344  }
  0x7e   :  { %v56_v36 = vpop.permute.xlu0 %55   ;;  %v66_v37 = vpop.permute.xlu1 %65  }
  0x7f   :  { %58 = vst.msk [vmem:[#allocation0] ss:$8 sm:$0x3] %vm57_vm6, %v56_v36   ;;  %vm217_vm6 = vcmask 392544  }
  0x80   :  { %68 = vst.msk [vmem:[#allocation0] ss:$8 sm:$0x3] %vm67_vm7, %v66_v37   ;;  %vm227_vm7 = vcmask 359744  }
  0x82   :  { %v76_v38 = vpop.permute.xlu0 %75   ;;  %v86_v39 = vpop.permute.xlu1 %85  }
  0x83   :  { %78 = vst.msk [vmem:[#allocation0] ss:$8 sm:$0x3] %vm77_vm8, %v76_v38   ;;  %vm237_vm8 = vcmask 326944  }
  0x84   :  { %88 = vst.msk [vmem:[#allocation0] ss:$8 sm:$0x3] %vm87_vm9, %v86_v39   ;;  %vm247_vm9 = vcmask 294144  }
  0x86   :  { %v96_v40 = vpop.permute.xlu0 %95   ;;  %v106_v41 = vpop.permute.xlu1 %105  }
  0x87   :  { %98 = vst.msk [vmem:[#allocation0] ss:$8 sm:$0x3] %vm97_vm10, %v96_v40   ;;  %vm257_vm10 = vcmask 261344  }
  0x88   :  { %108 = vst.msk [vmem:[#allocation0] ss:$8 sm:$0x3] %vm107_vm11, %v106_v41   ;;  %vm267_vm11 = vcmask 228544  }
  0x8a   :  { %v116_v42 = vpop.permute.xlu0 %115   ;;  %v126_v43 = vpop.permute.xlu1 %125  }
  0x8b   :  { %118 = vst.msk [vmem:[#allocation0] ss:$8 sm:$0x3] %vm117_vm12, %v116_v42   ;;  %vm277_vm12 = vcmask 195744  }
  0x8c   :  { %128 = vst.msk [vmem:[#allocation0] ss:$8 sm:$0x3] %vm127_vm13, %v126_v43   ;;  %vm287_vm13 = vcmask 162944  }
  0x8e   :  { %v136_v44 = vpop.permute.xlu0 %135   ;;  %v146_v45 = vpop.permute.xlu1 %145  }
  0x8f   :  { %138 = vst.msk [vmem:[#allocation0] ss:$8 sm:$0x3] %vm137_vm14, %v136_v44   ;;  %vm297_vm14 = vcmask 130144  }
  0x90   :  { %148 = vst.msk [vmem:[#allocation0] ss:$8 sm:$0x3] %vm147_vm15, %v146_v45   ;;  %vm307_vm15 = vcmask 97344  }
  0x92   :  { %v156_v46 = vpop.permute.xlu0 %155   ;;  %v166_v47 = vpop.permute.xlu1 %165  }
  0x93   :  { %158 = vst.msk [vmem:[#allocation0] ss:$8 sm:$0x3] %vm157_vm0, %v156_v46   ;;  %vm317_vm0 = vcmask 64544  }
  0x94   :  { %168 = vst.msk [vmem:[#allocation0] ss:$8 sm:$0x3] %vm167_vm1, %v166_v47  }
  0x96   :  { %v176_v48 = vpop.permute.xlu0 %175   ;;  %v186_v49 = vpop.permute.xlu1 %185  }
  0x97   :  { %178 = vst.msk [vmem:[#allocation0] ss:$8 sm:$0x3] %vm177_vm2, %v176_v48  }
  0x98   :  { %188 = vst.msk [vmem:[#allocation0] ss:$8 sm:$0x3] %vm187_vm3, %v186_v49  }
  0x9a   :  { %v196_v50 = vpop.permute.xlu0 %195   ;;  %v206_v51 = vpop.permute.xlu1 %205  }
  0x9b   :  { %198 = vst.msk [vmem:[#allocation0] ss:$8 sm:$0x3] %vm197_vm4, %v196_v50  }
  0x9c   :  { %208 = vst.msk [vmem:[#allocation0] ss:$8 sm:$0x3] %vm207_vm5, %v206_v51  }
  0x9e   :  { %v216_v52 = vpop.permute.xlu0 %215   ;;  %v226_v53 = vpop.permute.xlu1 %225  }
  0x9f   :  { %218 = vst.msk [vmem:[#allocation0] ss:$8 sm:$0x3] %vm217_vm6, %v216_v52  }
  0xa0   :  { %228 = vst.msk [vmem:[#allocation0] ss:$8 sm:$0x3] %vm227_vm7, %v226_v53  }
  0xa2   :  { %v236_v54 = vpop.permute.xlu0 %235   ;;  %v246_v55 = vpop.permute.xlu1 %245  }
  0xa3   :  { %238 = vst.msk [vmem:[#allocation0] ss:$8 sm:$0x3] %vm237_vm8, %v236_v54  }
  0xa4   :  { %248 = vst.msk [vmem:[#allocation0] ss:$8 sm:$0x3] %vm247_vm9, %v246_v55  }
  0xa6   :  { %v256_v56 = vpop.permute.xlu0 %255   ;;  %v266_v57 = vpop.permute.xlu1 %265  }
  0xa7   :  { %258 = vst.msk [vmem:[#allocation0] ss:$8 sm:$0x3] %vm257_vm10, %v256_v56  }
  0xa8   :  { %268 = vst.msk [vmem:[#allocation0] ss:$8 sm:$0x3] %vm267_vm11, %v266_v57  }
  0xaa   :  { %v276_v58 = vpop.permute.xlu0 %275   ;;  %v286_v59 = vpop.permute.xlu1 %285  }
  0xab   :  { %278 = vst.msk [vmem:[#allocation0] ss:$8 sm:$0x3] %vm277_vm12, %v276_v58  }
  0xac   :  { %288 = vst.msk [vmem:[#allocation0] ss:$8 sm:$0x3] %vm287_vm13, %v286_v59  }
  0xae   :  { %v296_v60 = vpop.permute.xlu0 %295   ;;  %v306_v61 = vpop.permute.xlu1 %305  }
  0xaf   :  { %298 = vst.msk [vmem:[#allocation0] ss:$8 sm:$0x3] %vm297_vm14, %v296_v60  }
  0xb0   :  { %308 = vst.msk [vmem:[#allocation0] ss:$8 sm:$0x3] %vm307_vm15, %v306_v61  }
  0xb2   :  { %v316_v62 = vpop.permute.xlu0 %315  }
  0xb3   :  { %318 = vst.msk [vmem:[#allocation0] ss:$8 sm:$0x3] %vm317_vm0, %v316_v62  }
  0xba   :  { %v322_v63 = vld [vmem:[#allocation0] sm:$0x1]  ;;  %v326_v0 = vld [vmem:[#allocation0 + $0x8] sm:$0x1] }
  0xbb   :  { %324 = vst [vmem:[%s697_s1] sm:$0x1] %v322_v63  ;;  %393 = vst [vmem:[%s697_s1 + $0x1] sm:$0x1] %v326_v0 }

// kernel: upsample_forward.1
= control target key start
LH: loop header
LB: loop body
LE: loop exit
PB: predicated region body
PF: predicated region fallthrough
CT: control target
= control target key end

     0   :  { %s863_s18 = smov 0   ;;  %s865_s19 = smov 0   ;;  %s1015_s0 = inlined_call_operand.vmem [shape: f32[2,18,64], index: 0, kind: input, shape index: {}]   ;;  %s1016_s1 = inlined_call_operand.vmem [shape: f32[64,128], index: 1, kind: input, shape index: {}]   ;;  %s1017_s2 = inlined_call_operand.vmem [shape: f32[64,256], index: 2, kind: input, shape index: {}]   ;;  %s1018_s3 = inlined_call_operand.vmem [shape: f32[64,128], index: 3, kind: input, shape index: {}]   ;;  %s1019_s4 = inlined_call_operand.vmem [shape: f32[1,256], index: 4, kind: input, shape index: {}]   ;;  %s1020_s5 = inlined_call_operand.vmem [shape: f32[2,16,256], index: 5, kind: output, shape index: {}]  }
   0x1   :  { %s867_s20 = smov 0  }
   0x2 LB: > { %s27_s21 = sadd.s32 1, %s826_s19  ;;  %p659_p0 = scmp.ge.s32.totalorder %s830_s20, 1  ;;  %s830_s20 = sphi %s867_s20, %s15_s20   ;;  %s826_s19 = sphi %s865_s19, %s1022_s19   ;;  %s822_s18 = sphi %s863_s18, %s1021_s18  }
   0x3   : > { %p29_p1 = scmp.ge.s32.totalorder %s27_s21, 2  ;;  %p201_p2 = scmp.lt.s32.totalorder %s830_s20, 3 }
   0x5   : > { %s1024_s21 = smov (%p29_p1, %s27_s21), 0  ;;  %p202_p3 = pnand %p659_p0, %p201_p2 }
   0x6   : > { %v278_v0 = vld [vmem:[%s1016_s1] sm:$0xff] (!%p202_p3)  ;;  %v279_v1 = vld [vmem:[%s1016_s1 + $0x8] sm:$0xff] (!%p202_p3)  ;;  %p234_p4 = scmp.lt.s32.totalorder (!%p202_p3), %s822_s18, 1  ;;  %v265_v4 = vld [vmem:[%s1017_s2 + $0x18] sm:$0xff] (!%p202_p3)  ;;  %v832_v7 = vmov (!%p202_p3), 0.0   ;;  %vm286_vm0 = vcmask (!%p202_p3), 523264   ;;  %v542_v55 = vlaneseq (!%p202_p3) }
   0x7   : > { %205 = sbr.rel (%p202_p3) target bundleno = 259 (0x103), region = 40  ;;  %v263_v2 = vld [vmem:[%s1017_s2 + $0x8] sm:$0xff] (!%p202_p3)  ;;  %v734_v3 = vpack.c.bf16 (!%p202_p3), %v279_v1, %v278_v0  ;;  %v262_v5 = vld [vmem:[%s1017_s2] sm:$0xff] (!%p202_p3)  ;;  %v264_v6 = vld [vmem:[%s1017_s2 + $0x10] sm:$0xff] (!%p202_p3)  ;;  %527 = vmatprep.mubr.f32.mxu0 (!%p202_p3), %v832_v7 }
   0x8   : > { %v766_v8 = vpack.c.bf16 (!%p202_p3), %v265_v4, %v263_v2  ;;  %v768_v9 = vpack.c.bf16 (!%p202_p3), %v264_v6, %v262_v5  ;;  %v280_v10 = vld [vmem:[%s1016_s1 + $0x10] sm:$0xff] (!%p202_p3)  ;;  %v281_v11 = vld [vmem:[%s1016_s1 + $0x18] sm:$0xff] (!%p202_p3)  ;;  %v267_v12 = vld [vmem:[%s1017_s2 + $0x28] sm:$0xff] (!%p202_p3)  ;;  %v543_v56 = vshrl.u32 (!%p202_p3), %v542_v55, 7 }
   0x9   : > { %735 = vmatprep.subr.bf16.mxu1 (!%p202_p3), %v734_v3  ;;  %v738_v13 = vpack.c.bf16 (!%p202_p3), %v281_v11, %v280_v10  ;;  %v269_v14 = vld [vmem:[%s1017_s2 + $0x38] sm:$0xff] (!%p202_p3)  ;;  %v266_v15 = vld [vmem:[%s1017_s2 + $0x20] sm:$0xff] (!%p202_p3)  ;;  %v268_v16 = vld [vmem:[%s1017_s2 + $0x30] sm:$0xff] (!%p202_p3) }
   0xa   : > { %767 = vmatprep.subr.bf16.mxu0 (!%p202_p3), %v766_v8  ;;  %737 = vmatpush3.bf16.msra.mxu1 (!%p202_p3), %v734_v3  ;;  %v770_v17 = vpack.c.bf16 (!%p202_p3), %v269_v14, %v267_v12  ;;  %v282_v18 = vld [vmem:[%s1016_s1 + $0x20] sm:$0xff] (!%p202_p3)  ;;  %v283_v19 = vld [vmem:[%s1016_s1 + $0x28] sm:$0xff] (!%p202_p3)  ;;  %v772_v21 = vpack.c.bf16 (!%p202_p3), %v268_v16, %v266_v15  ;;  %v273_v23 = vld [vmem:[%s1017_s2 + $0x58] sm:$0xff] (!%p202_p3)  ;;  %v544_v57 = vsub.s32 (!%p202_p3), 0, %v543_v56  ;;  %v548_v6 = vsub.s32 (!%p202_p3), 1, %v543_v56 }
   0xb   : > { %v271_v20 = vld [vmem:[%s1017_s2 + $0x48] sm:$0xff] (!%p202_p3)  ;;  %769 = vmatpush1.bf16.msra.mxu0 (!%p202_p3), %v768_v9  ;;  %739 = vmatprep.subr.bf16.mxu1 (!%p202_p3), %v738_v13  ;;  %v742_v22 = vpack.c.bf16 (!%p202_p3), %v283_v19, %v282_v18  ;;  %v270_v24 = vld [vmem:[%s1017_s2 + $0x40] sm:$0xff] (!%p202_p3)  ;;  %v272_v26 = vld [vmem:[%s1017_s2 + $0x50] sm:$0xff] (!%p202_p3) }
   0xc   : > { %771 = vmatprep.subr.bf16.mxu0 (!%p202_p3), %v770_v17  ;;  %v774_v25 = vpack.c.bf16 (!%p202_p3), %v273_v23, %v271_v20  ;;  %v284_v27 = vld [vmem:[%s1016_s1 + $0x30] sm:$0xff] (!%p202_p3)  ;;  %v285_v28 = vld [vmem:[%s1016_s1 + $0x38] sm:$0xff] (!%p202_p3)  ;;  %v275_v29 = vld [vmem:[%s1017_s2 + $0x68] sm:$0xff] (!%p202_p3)  ;;  %v776_v32 = vpack.c.bf16 (!%p202_p3), %v272_v26, %v270_v24 }
   0xd   : > { %v277_v30 = vld [vmem:[%s1017_s2 + $0x78] sm:$0xff] (!%p202_p3)  ;;  %v746_v33 = vpack.c.bf16 (!%p202_p3), %v285_v28, %v284_v27  ;;  %v274_v34 = vld [vmem:[%s1017_s2 + $0x60] sm:$0xff] (!%p202_p3)  ;;  %v276_v36 = vld [vmem:[%s1017_s2 + $0x70] sm:$0xff] (!%p202_p3) }
   0xe   : > { %s1026_s18 = smov (!%p234_p4, %s822_s18), 1  ;;  %741 = vmatpush3.bf16.msra.mxu1 %v738_v13  ;;  %v778_v35 = vpack.c.bf16 %v277_v30, %v275_v29  ;;  %v368_v37 = vld [vmem:[%s1018_s3] sm:$0xff]  ;;  %v369_v38 = vld [vmem:[%s1018_s3 + $0x8] sm:$0xff]  ;;  %v780_v39 = vpack.c.bf16 %v276_v36, %v274_v34  ;;  %v370_v41 = vld [vmem:[%s1018_s3 + $0x10] sm:$0xff] }
   0xf   : > { %s782_s6 = smul.u32 24, %s1026_s18  ;;  %773 = vmatpush1.bf16.msra.mxu0 %v772_v21  ;;  %743 = vmatprep.subr.bf16.mxu1 %v742_v22  ;;  %v750_v40 = vpack.c.bf16 %v369_v38, %v368_v37  ;;  %v371_v42 = vld [vmem:[%s1018_s3 + $0x18] sm:$0xff]  ;;  %v372_v46 = vld [vmem:[%s1018_s3 + $0x20] sm:$0xff]  ;;  %v373_v47 = vld [vmem:[%s1018_s3 + $0x28] sm:$0xff]  ;;  %s675_s30 = sshll.u32 %s1026_s18, 5 }
  0x10   : > { %775 = vmatprep.subr.bf16.mxu0 %v774_v25  ;;  %v754_v45 = vpack.c.bf16 %v371_v42, %v370_v41  ;;  %v758_v50 = vpack.c.bf16 %v373_v47, %v372_v46  ;;  %v374_v51 = vld [vmem:[%s1018_s3 + $0x30] sm:$0xff]  ;;  %v375_v52 = vld [vmem:[%s1018_s3 + $0x38] sm:$0xff]  ;;  %v540_v58 = vld [vmem:[%s1019_s4] sm:$0x3] }
  0x11   : > { %s948_s23 = scalar_lea.vmem %s1015_s0, %s782_s6  ;;  %v762_v53 = vpack.c.bf16 %v375_v52, %v374_v51  ;;  %v545_v60 = vrot.slane %v540_v58, %v544_v57 }
  0x12   : > { %v252_v31 = vld [vmem:[%s948_s23] sm:$0xff]  ;;  %745 = vmatpush3.bf16.msra.mxu1 %v742_v22  ;;  %v253_v43 = vld [vmem:[%s948_s23 + $0x8] sm:$0xff] }
  0x13   : > { %712 = vmatprep.mubr.msk.f32.mxu1 %vm286_vm0, %v252_v31  ;;  %777 = vmatpush1.bf16.msra.mxu0 %v776_v32  ;;  %v663_v44 = vld [vmem:[%s948_s23 + $0x1] sm:$0xff]  ;;  %v664_v49 = vld [vmem:[%s948_s23 + $0x9] sm:$0xff] }
  0x14   : > { %747 = vmatprep.subr.bf16.mxu1 %v746_v33  ;;  %779 = vmatprep.subr.bf16.mxu0 %v778_v35  ;;  %v665_v48 = vld [vmem:[%s948_s23 + $0x2] sm:$0xff]  ;;  %v666_v54 = vld [vmem:[%s948_s23 + $0xa] sm:$0xff]  ;;  %s248_s23 = scalar_lea.vmem %s1020_s5, %s675_s30 }
  0x16   : > { %749 = vmatpush3.bf16.msra.mxu1 %v746_v33 }
  0x17   : > { %781 = vmatpush1.bf16.msra.mxu0 %v780_v39  ;;  %751 = vmatprep.subr.bf16.mxu1 %v750_v40 }
  0x19   : > { %713 = vmatmul.mubr.msk.f32.vlgmr.msra.gmra.mrb[0].mxu1 %vm286_vm0, %v253_v43 }
  0x1a   : > { %671 = vmatmul.mubr.msk.f32.vlgmr.msra.gmra.mrb[0].mxu0 %vm286_vm0, %v663_v44  ;;  %753 = vmatpush3.bf16.msra.mxu1 %v750_v40 }
  0x1b   : > { %533 = vmatprep.mubr.f32.mxu0 %v832_v7  ;;  %755 = vmatprep.subr.bf16.mxu1 %v754_v45  ;;  %v549_v7 = vrot.slane %v540_v58, %v548_v6 }
  0x1c   : > { %731 = vmatprep.mubr.msk.f32.mxu1 %vm286_vm0, %v665_v48 }
  0x1e   : > { %672 = vmatmul.mubr.msk.f32.gmra.mrb[2].mxu0 %vm286_vm0, %v664_v49  ;;  %757 = vmatpush3.bf16.msra.mxu1 %v754_v45 }
  0x1f   : > { %759 = vmatprep.subr.bf16.mxu1 %v758_v50 }
  0x22   : > { %761 = vmatpush3.bf16.msra.mxu1 %v758_v50 }
  0x23   : > { %763 = vmatprep.subr.bf16.mxu1 %v762_v53 }
  0x26   : > { %765 = vmatpush3.bf16.msra.mxu1 %v762_v53 }
  0x29   : > { %732 = vmatmul.mubr.msk.f32.vlgmr.msra.gmra.mrb[2].mxu1 %vm286_vm0, %v666_v54 }
  0xec   : > { %v714_v59 = vpop.f32.mrb[0].mxu1 }
  0xed   : > { %v359_v61 = vpop.f32.mrb[1].mxu1  ;;  %v529_v62 = vpop.f32.mrb[0].mxu0 }
  0xee   : > { %v530_v63 = vadd.f32 %v529_v62, %v359_v61  ;;  %v531_v0 = vpop.f32.mrb[1].mxu0 }
  0xf0   : > { %v552_v1 = vadd.f32 %v545_v60, %v530_v63 }
  0xf1   : > { %v535_v2 = vpop.f32.mrb[2].mxu0 }
  0xf2   : > { %556 = vst [vmem:[%s248_s23] sm:$0xff] %v552_v1  ;;  %v536_v3 = vadd.f32 %v714_v59, %v535_v2  ;;  %v537_v4 = vpop.f32.mrb[3].mxu0 }
  0xf4   : > { %v554_v5 = vadd.f32 %v545_v60, %v536_v3 }
  0xf6   : > { %558 = vst [vmem:[%s248_s23 + $0x10] sm:$0xff] %v554_v5 }
  0xfc   : > { %v733_v8 = vpop.f32.mrb[2].mxu1 }
  0xfd   : > { %v538_v9 = vadd.f32 %v733_v8, %v537_v4  ;;  %v448_v10 = vpop.f32.mrb[3].mxu1 }
  0xfe   : > { %v532_v11 = vadd.f32 %v531_v0, %v448_v10 }
  0xff   : > { %v555_v12 = vadd.f32 %v549_v7, %v538_v9 }
 0x100   : > { %v553_v13 = vadd.f32 %v549_v7, %v532_v11 }
 0x101   : > { %559 = vst [vmem:[%s248_s23 + $0x18] sm:$0xff] %v555_v12 }
 0x102   : > { %557 = vst [vmem:[%s248_s23 + $0x8] sm:$0xff] %v553_v13 }
 0x103 PF: > { %s15_s20 = sadd.s32 1, %s830_s20   ;;  %s1021_s18 = smov %s826_s19 }
 0x104   : > { %p12_p5 = scmp.ge.s32.totalorder %s15_s20, 4   ;;  %s1022_s19 = smov %s1024_s21 }
 0x106   :  { %14 = sbr.rel (!%p12_p5) target bundleno = 2 (0x2), region = 73 }

</bundles_post_ra>
